<compile_context>
chip_gen: v7x
topology: tpu7x:2x2x1
jax: 0.10.0
libtpu: 0.0.40
codegen_flags: <defaults>
</compile_context>

<pallas_src>
import functools

import jax
import jax.numpy as jnp
from jax import lax
from jax.experimental import pallas as pl
from jax.experimental.pallas import tpu as pltpu


def _round_up(n, m):
    return ((n + m - 1) // m) * m


# --------------------------- packed parameter layout --------------------------

def build_layout(encoder_layer_dims, z_dim, class_num, lane=128, align_splits=True):
    """Static layout: one bf16 weight slab, one f32 vector slab, one input slab.

    align_splits pads the downsample / logvar sub-blocks of the fused matmuls to
    a 128-lane boundary (free slices on v6e/v7x; set False on v5e if the extra
    128-wide MXU pass matters there).
    """
    dims = tuple(encoder_layer_dims)
    n_res = len(dims) - 1
    zh = z_dim // 2
    zh_pad = _round_up(zh, 16)            # keeps fc4's bf16 K-row-slice 16-aligned
    out_pad = _round_up(class_num, lane)  # lane-dense output (unmasked vst)

    mats = {}
    col = 0

    def add_mat(name, in_dim, width, split=None):
        nonlocal col
        mats[name] = dict(in_dim=in_dim, width=width, start=col, split=split)
        col = _round_up(col + width, lane)

    for i in range(n_res):
        in_d, out_d = dims[i], dims[i + 1]
        if in_d != out_d:                  # fused (fc || downsample)
            split = _round_up(out_d, lane) if align_splits else out_d
            add_mat(f"res{i}", in_d, split + out_d, split)
        else:
            add_mat(f"res{i}", in_d, out_d, None)
    h = dims[-1]
    hsplit = _round_up(z_dim, lane) if align_splits else z_dim
    add_mat("heads", h, hsplit + z_dim, hsplit)        # fused mu || logvar
    add_mat("fc3", z_dim, zh_pad)
    add_mat("fc4", zh_pad, out_pad)

    w_rows = _round_up(max(m["in_dim"] for m in mats.values()), 16)  # bf16 tile
    w_cols = col

    vec_rows = []
    for i in range(n_res):
        vec_rows.append((f"b_res{i}", mats[f"res{i}"]["width"]))
        vec_rows.append((f"g_bn{i}", dims[i + 1]))
        vec_rows.append((f"be_bn{i}", dims[i + 1]))
    vec_rows.append(("b_heads", mats["heads"]["width"]))
    vec_rows.append(("b_fc3", zh_pad))
    vec_rows.append(("g_bn3", zh_pad))
    vec_rows.append(("be_bn3", zh_pad))
    vec_rows.append(("beta_sw", zh_pad))   # Swish beta, replicated across the row
    vec_rows.append(("b_fc4", out_pad))

    v_cols = _round_up(max(w for _, w in vec_rows), lane)
    v_rows = _round_up(len(vec_rows), 8)

    x_dim = dims[0]
    eps_off = _round_up(x_dim, lane)       # eps lands vreg-aligned with mu
    in_width = _round_up(eps_off + z_dim, lane)

    return dict(
        n_res=n_res, encoder_layer_dims=dims, z_dim=z_dim, class_num=class_num,
        zh=zh, zh_pad=zh_pad, out_pad=out_pad,
        mats=mats,
        w_shape=(w_rows, w_cols),
        vec_row={name: r for r, (name, _) in enumerate(vec_rows)},
        vec_width={name: w for name, w in vec_rows},
        v_shape=(v_rows, v_cols),
        x_dim=x_dim, eps_off=eps_off, in_width=in_width,
    )


def pack_params(params, layout):
    """One-time (init-time) packing of torch-layout params into kernel slabs."""
    w = jnp.zeros(layout["w_shape"], jnp.float32)
    v = jnp.zeros(layout["v_shape"], jnp.float32)
    mats = layout["mats"]
    vrow = layout["vec_row"]

    def put_w(name, block, col_off=0):      # block already (in_dim, out_dim)
        nonlocal w
        st = mats[name]["start"] + col_off
        r, c = block.shape
        w = w.at[:r, st:st + c].set(block.astype(jnp.float32))

    def put_v(name, vals, col_off=0):
        nonlocal v
        r = vrow[name]
        v = v.at[r, col_off:col_off + vals.shape[0]].set(vals.astype(jnp.float32))

    dims = layout["encoder_layer_dims"]
    for i in range(layout["n_res"]):
        blk = params["res"][i]
        m = mats[f"res{i}"]
        put_w(f"res{i}", blk["w_fc"].T)
        put_v(f"b_res{i}", blk["b_fc"])
        if m["split"] is not None:
            put_w(f"res{i}", blk["w_ds"].T, col_off=m["split"])
            put_v(f"b_res{i}", blk["b_ds"], col_off=m["split"])
        put_v(f"g_bn{i}", blk["g_bn"])
        put_v(f"be_bn{i}", blk["be_bn"])

    mh = mats["heads"]
    put_w("heads", params["w21"].T)
    put_w("heads", params["w22"].T, col_off=mh["split"])
    put_v("b_heads", params["b21"])
    put_v("b_heads", params["b22"], col_off=mh["split"])

    put_w("fc3", params["w3"].T)
    put_v("b_fc3", params["b3"])
    put_v("g_bn3", params["g_bn3"])
    put_v("be_bn3", params["be_bn3"])

    put_w("fc4", params["w4"].T)
    put_v("b_fc4", params["b4"])

    beta_row = jnp.full((layout["zh_pad"],), params["beta_sw"], jnp.float32)
    put_v("beta_sw", beta_row)

    # bf16 weights for the MXU; vector slab stays f32 for the VPU/EUP math.
    return w.astype(jnp.bfloat16), v


# ------------------------------- Pallas kernel --------------------------------

def make_kernel(layout):
    dims = layout["encoder_layer_dims"]
    n_res = layout["n_res"]
    z_dim = layout["z_dim"]
    x_dim = layout["x_dim"]
    eps_off = layout["eps_off"]
    mats = layout["mats"]
    vrow = layout["vec_row"]
    vwidth = layout["vec_width"]

    def kernel(in_ref, w_ref, v_ref, out_ref):
        def vec(name):
            # Direct single-sublane load from the vector slab (no slab-wide load).
            r = vrow[name]
            return v_ref[r:r + 1, 0:vwidth[name]]

        def mm(h, name):
            m = mats[name]
            w = w_ref[0:m["in_dim"], m["start"]:m["start"] + m["width"]]  # bf16
            return jnp.dot(h.astype(jnp.bfloat16), w,
                           preferred_element_type=jnp.float32)

        def bn(h, g, be):
            # training-mode BatchNorm1d: batch stats, biased variance, eps=1e-5.
            # E[x^2] - mean^2 -> the two reductions are independent and overlap.
            mean = jnp.mean(h, axis=0, keepdims=True)
            mean_sq = jnp.mean(h * h, axis=0, keepdims=True)
            var = mean_sq - mean * mean
            return (h - mean) * lax.rsqrt(var + 1e-5) * g + be

        def lrelu(h):
            return jnp.where(h >= 0.0, h, 0.01 * h)

        h = in_ref[:, 0:x_dim]
        eps = in_ref[:, eps_off:eps_off + z_dim]

        # --- ResBlocks: fused (fc || downsample) matmul, lane-aligned splits ---
        for i in range(n_res):
            out_d = dims[i + 1]
            m = mats[f"res{i}"]
            y = mm(h, f"res{i}") + vec(f"b_res{i}")
            if m["split"] is not None:
                fc_out = y[:, 0:out_d]
                skip = y[:, m["split"]:m["split"] + out_d]
            else:
                fc_out, skip = y, h
            h = lrelu(bn(fc_out, vec(f"g_bn{i}"), vec(f"be_bn{i}"))) + skip

        # --- fused mu / logvar heads (logvar at a 128-aligned split) ---
        mh = mats["heads"]
        y = mm(h, "heads") + vec("b_heads")
        mu = y[:, 0:z_dim]
        logvar = y[:, mh["split"]:mh["split"] + z_dim]

        # --- reparameterize: z = mu + eps * exp(0.5 * logvar) ---
        z = mu + eps * jnp.exp(0.5 * logvar)

        # --- classifier: fc3 (spectral-norm), bn3, swish(beta), fc4 (spectral-norm)
        h3 = mm(z, "fc3") + vec("b_fc3")
        h3 = bn(h3, vec("g_bn3"), vec("be_bn3"))
        beta = vec("beta_sw")                       # (1, zh_pad), beta replicated
        h3 = h3 * jax.nn.sigmoid(beta * h3)

        # --- lane-dense (B, out_pad) output, unmasked vst ---
        out_ref[...] = mm(h3, "fc4") + vec("b_fc4")

    return kernel


# ------------------------------ glue / wrapper --------------------------------

def vae_classification_forward(x, eps, w_slab, v_slab, *, layout):
    """x: (B, D_in) f32, eps: (B, z_dim) f32 -> class_logits (B, class_num)."""
    B = x.shape[0]
    class_num = layout["class_num"]
    out_pad = layout["out_pad"]
    e_off = layout["eps_off"]

    # Fused lane-dense input slab: x at lanes [0:D_in], eps at the next
    # 128-aligned offset (single unmasked DMA, one VMEM input buffer).
    in_slab = jnp.zeros((B, layout["in_width"]), jnp.float32)
    in_slab = in_slab.at[:, :x.shape[1]].set(x.astype(jnp.float32))
    in_slab = in_slab.at[:, e_off:e_off + eps.shape[1]].set(eps.astype(jnp.float32))

    kernel = make_kernel(layout)

    flops = int(sum(2 * B * m["in_dim"] * m["width"] for m in layout["mats"].values()))
    transcendentals = int(B * (layout["z_dim"] + layout["zh_pad"]))  # exp + sigmoid
    bytes_accessed = int(4 * (in_slab.size + v_slab.size + B * out_pad)
                         + 2 * w_slab.size)

    vmem = pl.BlockSpec(memory_space=pltpu.MemorySpace.VMEM)

    out = pl.pallas_call(
        kernel,
        out_shape=jax.ShapeDtypeStruct((B, out_pad), jnp.float32),
        in_specs=[vmem, vmem, vmem],
        out_specs=vmem,
        compiler_params=pltpu.CompilerParams(vmem_limit_bytes=32 * 1024 * 1024),
        cost_estimate=pl.CostEstimate(flops=flops,
                                      transcendentals=transcendentals,
                                      bytes_accessed=bytes_accessed),
    )(in_slab, w_slab, v_slab)
    return out[:, :class_num]


# ------------------------------ param init ------------------------------------

def _spectral_normalize(w, n_power_iterations=5):
    """Deterministic power-iteration spectral norm (w is (out_dim, in_dim))."""
    # TODO(synk): if weights ever update, re-run this and re-pack the slab each
    # step with a persistent u vector to match torch's spectral_norm exactly.
    out_dim = w.shape[0]
    u = jnp.ones((out_dim,), jnp.float32) / jnp.sqrt(jnp.float32(out_dim))
    v = None
    for _ in range(n_power_iterations):
        v = w.T @ u
        v = v / (jnp.linalg.norm(v) + 1e-12)
        u = w @ v
        u = u / (jnp.linalg.norm(u) + 1e-12)
    sigma = u @ (w @ v)
    return w / sigma


def init_params(key, encoder_layer_dims, hidden_dim_layer_out_z, z_dim, class_num):
    """Deterministic synthetic parameter init mirroring the module's shapes."""
    params = {}
    ks = iter(jax.random.split(key, 64))

    def linear_init(in_d, out_d, scale):
        w = jax.random.normal(next(ks), (out_d, in_d), jnp.float32) * scale  # torch (out, in)
        b = jax.random.normal(next(ks), (out_d,), jnp.float32) * 0.01
        return w, b

    res = []
    for i in range(len(encoder_layer_dims) - 1):
        in_d, out_d = encoder_layer_dims[i], encoder_layer_dims[i + 1]
        w_fc, b_fc = linear_init(in_d, out_d, (2.0 / in_d) ** 0.5)  # kaiming-ish
        g_bn = jnp.ones((out_d,), jnp.float32)
        be_bn = jnp.zeros((out_d,), jnp.float32)
        if in_d != out_d:
            w_ds, b_ds = linear_init(in_d, out_d, (2.0 / in_d) ** 0.5)
        else:
            w_ds, b_ds = None, None
        res.append(dict(w_fc=w_fc, b_fc=b_fc, g_bn=g_bn, be_bn=be_bn,
                        w_ds=w_ds, b_ds=b_ds))
    params["res"] = res

    h = hidden_dim_layer_out_z
    params["w21"], params["b21"] = linear_init(h, z_dim, (2.0 / (h + z_dim)) ** 0.5)
    params["w22"], params["b22"] = linear_init(h, z_dim, (2.0 / (h + z_dim)) ** 0.5)

    w3, b3 = linear_init(z_dim, z_dim // 2, (2.0 / z_dim) ** 0.5)
    params["w3"] = _spectral_normalize(w3, 5)
    params["b3"] = b3
    params["g_bn3"] = jnp.ones((z_dim // 2,), jnp.float32)
    params["be_bn3"] = jnp.zeros((z_dim // 2,), jnp.float32)
    params["beta_sw"] = jnp.float32(1.0)  # trainable Swish beta, initial 1.0

    w4, b4 = linear_init(z_dim // 2, class_num, (2.0 / (z_dim // 2 + class_num)) ** 0.5)
    params["w4"] = _spectral_normalize(w4, 5)
    params["b4"] = b4
    return params


# --------------------------- pure-JAX reference --------------------------------

def reference_forward(x, eps, params, matmul_dtype=jnp.float32):
    """Module-faithful reference; matmul_dtype=bf16 emulates the kernel's MXU dtype."""
    def lin(h, w, b):
        return jnp.dot(h.astype(matmul_dtype), w.T.astype(matmul_dtype),
                       preferred_element_type=jnp.float32) + b

    def bn(h, g, be):
        m = h.mean(axis=0, keepdims=True)
        v = ((h - m) ** 2).mean(axis=0, keepdims=True)
        return (h - m) / jnp.sqrt(v + 1e-5) * g + be

    def lrelu(h):
        return jnp.where(h >= 0.0, h, 0.01 * h)

    h = x
    for blk in params["res"]:
        out = lrelu(bn(lin(h, blk["w_fc"], blk["b_fc"]), blk["g_bn"], blk["be_bn"]))
        skip = lin(h, blk["w_ds"], blk["b_ds"]) if blk["w_ds"] is not None else h
        h = out + skip
    mu = lin(h, params["w21"], params["b21"])
    logvar = lin(h, params["w22"], params["b22"])
    z = mu + eps * jnp.exp(0.5 * logvar)
    h3 = lin(z, params["w3"], params["b3"])
    h3 = bn(h3, params["g_bn3"], params["be_bn3"])
    h3 = h3 * jax.nn.sigmoid(params["beta_sw"] * h3)
    return lin(h3, params["w4"], params["b4"])


# ---------------------------------- main ---------------------------------------

if __name__ == "__main__":
    Encoder_layer_dims = [64, 128, 32]   # consecutive dims differ -> downsample path
    hidden_dim_layer_out_Z = Encoder_layer_dims[-1]   # 32
    z_dim = 16
    class_num = 4
    batch = 8

    key = jax.random.PRNGKey(0)
    k_param, k_x, k_eps = jax.random.split(key, 3)

    params = init_params(k_param, Encoder_layer_dims, hidden_dim_layer_out_Z,
                         z_dim, class_num)

    # One-time packing / transposing / bf16 cast, hoisted out of the hot path.
    layout = build_layout(Encoder_layer_dims, z_dim, class_num)
    w_slab, v_slab = pack_params(params, layout)

    x = jax.random.normal(k_x, (batch, Encoder_layer_dims[0]), jnp.float32)
    eps = jax.random.normal(k_eps, (batch, z_dim), jnp.float32)  # reparam noise

    fwd = jax.jit(functools.partial(vae_classification_forward, layout=layout))
    logits = fwd(x, eps, w_slab, v_slab)
    jax.block_until_ready(logits)

    assert logits.shape == (batch, class_num), logits.shape
    assert bool(jnp.all(jnp.isfinite(logits)))

    # Tight check against a reference with the same bf16 matmul-input rounding.
    ref_bf16 = reference_forward(x, eps, params, matmul_dtype=jnp.bfloat16)
    assert bool(jnp.allclose(logits, ref_bf16, atol=1e-2, rtol=1e-2)), (
        float(jnp.max(jnp.abs(logits - ref_bf16))))

    # Loose sanity check against the full-f32 module reference (bf16 MXU inputs
    # trade a small amount of accuracy for ~3x fewer MXU passes).
    ref_f32 = reference_forward(x, eps, params)
    assert bool(jnp.allclose(logits, ref_f32, atol=2e-1, rtol=1e-1)), (
        float(jnp.max(jnp.abs(logits - ref_f32))))

    print("KERNEL_OK")
</pallas_src>

<mosaic_0001>
module attributes {stable_mosaic.version = 11 : i64} {
  func.func @kernel(%arg0: memref<8x256xf32, #tpu.memory_space<vmem>>, %arg1: memref<128x1024xbf16, #tpu.memory_space<vmem>>, %arg2: memref<16x256xf32, #tpu.memory_space<vmem>>, %arg3: memref<8x128xf32, #tpu.memory_space<vmem>>) attributes {dimension_semantics = [], scalar_prefetch = 0 : i64, scratch_operands = 0 : i64, tpu.core_type = #tpu.core_type<tc>} {
    %c0 = arith.constant 0 : index
    %c0_0 = arith.constant 0 : index
    %0 = vector.load %arg0[%c0, %c0_0] : memref<8x256xf32, #tpu.memory_space<vmem>>, vector<8x64xf32>
    %c0_1 = arith.constant 0 : index
    %c128 = arith.constant 128 : index
    %1 = vector.load %arg0[%c0_1, %c128] : memref<8x256xf32, #tpu.memory_space<vmem>>, vector<8x16xf32>
    %c0_2 = arith.constant 0 : index
    %c0_3 = arith.constant 0 : index
    %2 = vector.load %arg1[%c0_2, %c0_3] : memref<128x1024xbf16, #tpu.memory_space<vmem>>, vector<64x256xbf16>
    %3 = arith.truncf %0 : vector<8x64xf32> to vector<8x64xbf16>
    %cst = arith.constant dense<0.000000e+00> : vector<8x256xf32>
    %4 = tpu.matmul %3, %2, %cst {dimension_numbers = #tpu.dot_dimension_numbers<[1], [0], [0], [1], [0, 0, 1, 1], [], []>} : vector<8x64xbf16>, vector<64x256xbf16>, vector<8x256xf32> -> vector<8x256xf32>
    %c0_4 = arith.constant 0 : index
    %c0_5 = arith.constant 0 : index
    %5 = vector.load %arg2[%c0_4, %c0_5] : memref<16x256xf32, #tpu.memory_space<vmem>>, vector<1x256xf32>
    %6 = vector.broadcast %5 : vector<1x256xf32> to vector<8x256xf32>
    %7 = arith.addf %4, %6 : vector<8x256xf32>
    %8 = vector.extract_strided_slice %7 {offsets = [0, 0], sizes = [8, 128], strides = [1, 1]} : vector<8x256xf32> to vector<8x128xf32>
    %9 = vector.extract_strided_slice %7 {offsets = [0, 128], sizes = [8, 128], strides = [1, 1]} : vector<8x256xf32> to vector<8x128xf32>
    %c1 = arith.constant 1 : index
    %c0_6 = arith.constant 0 : index
    %10 = vector.load %arg2[%c1, %c0_6] : memref<16x256xf32, #tpu.memory_space<vmem>>, vector<1x128xf32>
    %c2 = arith.constant 2 : index
    %c0_7 = arith.constant 0 : index
    %11 = vector.load %arg2[%c2, %c0_7] : memref<16x256xf32, #tpu.memory_space<vmem>>, vector<1x128xf32>
    %cst_8 = arith.constant dense<0.000000e+00> : vector<128xf32>
    %12 = vector.multi_reduction <add>, %8, %cst_8 [0] : vector<8x128xf32> to vector<128xf32>
    %13 = vector.shape_cast %12 : vector<128xf32> to vector<1x128xf32>
    %cst_9 = arith.constant 8.000000e+00 : f32
    %14 = vector.broadcast %cst_9 : f32 to vector<1x128xf32>
    %15 = arith.divf %13, %14 : vector<1x128xf32>
    %16 = arith.mulf %8, %8 : vector<8x128xf32>
    %cst_10 = arith.constant dense<0.000000e+00> : vector<128xf32>
    %17 = vector.multi_reduction <add>, %16, %cst_10 [0] : vector<8x128xf32> to vector<128xf32>
    %18 = vector.shape_cast %17 : vector<128xf32> to vector<1x128xf32>
    %cst_11 = arith.constant 8.000000e+00 : f32
    %19 = vector.broadcast %cst_11 : f32 to vector<1x128xf32>
    %20 = arith.divf %18, %19 : vector<1x128xf32>
    %21 = arith.mulf %15, %15 : vector<1x128xf32>
    %22 = arith.subf %20, %21 : vector<1x128xf32>
    %23 = vector.broadcast %15 : vector<1x128xf32> to vector<8x128xf32>
    %24 = arith.subf %8, %23 : vector<8x128xf32>
    %cst_12 = arith.constant 9.99999974E-6 : f32
    %25 = vector.broadcast %cst_12 : f32 to vector<1x128xf32>
    %26 = arith.addf %22, %25 : vector<1x128xf32>
    %27 = math.rsqrt %26 : vector<1x128xf32>
    %28 = vector.broadcast %27 : vector<1x128xf32> to vector<8x128xf32>
    %29 = arith.mulf %24, %28 : vector<8x128xf32>
    %30 = vector.broadcast %10 : vector<1x128xf32> to vector<8x128xf32>
    %31 = arith.mulf %29, %30 : vector<8x128xf32>
    %32 = vector.broadcast %11 : vector<1x128xf32> to vector<8x128xf32>
    %33 = arith.addf %31, %32 : vector<8x128xf32>
    %cst_13 = arith.constant 0.000000e+00 : f32
    %34 = vector.broadcast %cst_13 : f32 to vector<8x128xf32>
    %35 = arith.cmpf oge, %33, %34 : vector<8x128xf32>
    %cst_14 = arith.constant 0.00999999977 : f32
    %36 = vector.broadcast %cst_14 : f32 to vector<8x128xf32>
    %37 = arith.mulf %36, %33 : vector<8x128xf32>
    %38 = arith.select %35, %33, %37 : vector<8x128xi1>, vector<8x128xf32>
    %39 = arith.addf %38, %9 : vector<8x128xf32>
    %c0_15 = arith.constant 0 : index
    %c256 = arith.constant 256 : index
    %40 = vector.load %arg1[%c0_15, %c256] : memref<128x1024xbf16, #tpu.memory_space<vmem>>, vector<128x160xbf16>
    %41 = arith.truncf %39 : vector<8x128xf32> to vector<8x128xbf16>
    %cst_16 = arith.constant dense<0.000000e+00> : vector<8x160xf32>
    %42 = tpu.matmul %41, %40, %cst_16 {dimension_numbers = #tpu.dot_dimension_numbers<[1], [0], [0], [1], [0, 0, 1, 1], [], []>} : vector<8x128xbf16>, vector<128x160xbf16>, vector<8x160xf32> -> vector<8x160xf32>
    %c3 = arith.constant 3 : index
    %c0_17 = arith.constant 0 : index
    %43 = vector.load %arg2[%c3, %c0_17] : memref<16x256xf32, #tpu.memory_space<vmem>>, vector<1x160xf32>
    %44 = vector.broadcast %43 : vector<1x160xf32> to vector<8x160xf32>
    %45 = arith.addf %42, %44 : vector<8x160xf32>
    %46 = vector.extract_strided_slice %45 {offsets = [0, 0], sizes = [8, 32], strides = [1, 1]} : vector<8x160xf32> to vector<8x32xf32>
    %47 = vector.extract_strided_slice %45 {offsets = [0, 128], sizes = [8, 32], strides = [1, 1]} : vector<8x160xf32> to vector<8x32xf32>
    %c4 = arith.constant 4 : index
    %c0_18 = arith.constant 0 : index
    %48 = vector.load %arg2[%c4, %c0_18] : memref<16x256xf32, #tpu.memory_space<vmem>>, vector<1x32xf32>
    %c5 = arith.constant 5 : index
    %c0_19 = arith.constant 0 : index
    %49 = vector.load %arg2[%c5, %c0_19] : memref<16x256xf32, #tpu.memory_space<vmem>>, vector<1x32xf32>
    %cst_20 = arith.constant dense<0.000000e+00> : vector<32xf32>
    %50 = vector.multi_reduction <add>, %46, %cst_20 [0] : vector<8x32xf32> to vector<32xf32>
    %51 = vector.shape_cast %50 : vector<32xf32> to vector<1x32xf32>
    %cst_21 = arith.constant 8.000000e+00 : f32
    %52 = vector.broadcast %cst_21 : f32 to vector<1x32xf32>
    %53 = arith.divf %51, %52 : vector<1x32xf32>
    %54 = arith.mulf %46, %46 : vector<8x32xf32>
    %cst_22 = arith.constant dense<0.000000e+00> : vector<32xf32>
    %55 = vector.multi_reduction <add>, %54, %cst_22 [0] : vector<8x32xf32> to vector<32xf32>
    %56 = vector.shape_cast %55 : vector<32xf32> to vector<1x32xf32>
    %cst_23 = arith.constant 8.000000e+00 : f32
    %57 = vector.broadcast %cst_23 : f32 to vector<1x32xf32>
    %58 = arith.divf %56, %57 : vector<1x32xf32>
    %59 = arith.mulf %53, %53 : vector<1x32xf32>
    %60 = arith.subf %58, %59 : vector<1x32xf32>
    %61 = vector.broadcast %53 : vector<1x32xf32> to vector<8x32xf32>
    %62 = arith.subf %46, %61 : vector<8x32xf32>
    %cst_24 = arith.constant 9.99999974E-6 : f32
    %63 = vector.broadcast %cst_24 : f32 to vector<1x32xf32>
    %64 = arith.addf %60, %63 : vector<1x32xf32>
    %65 = math.rsqrt %64 : vector<1x32xf32>
    %66 = vector.broadcast %65 : vector<1x32xf32> to vector<8x32xf32>
    %67 = arith.mulf %62, %66 : vector<8x32xf32>
    %68 = vector.broadcast %48 : vector<1x32xf32> to vector<8x32xf32>
    %69 = arith.mulf %67, %68 : vector<8x32xf32>
    %70 = vector.broadcast %49 : vector<1x32xf32> to vector<8x32xf32>
    %71 = arith.addf %69, %70 : vector<8x32xf32>
    %cst_25 = arith.constant 0.000000e+00 : f32
    %72 = vector.broadcast %cst_25 : f32 to vector<8x32xf32>
    %73 = arith.cmpf oge, %71, %72 : vector<8x32xf32>
    %cst_26 = arith.constant 0.00999999977 : f32
    %74 = vector.broadcast %cst_26 : f32 to vector<8x32xf32>
    %75 = arith.mulf %74, %71 : vector<8x32xf32>
    %76 = arith.select %73, %71, %75 : vector<8x32xi1>, vector<8x32xf32>
    %77 = arith.addf %76, %47 : vector<8x32xf32>
    %c0_27 = arith.constant 0 : index
    %c512 = arith.constant 512 : index
    %78 = vector.load %arg1[%c0_27, %c512] : memref<128x1024xbf16, #tpu.memory_space<vmem>>, vector<32x144xbf16>
    %79 = arith.truncf %77 : vector<8x32xf32> to vector<8x32xbf16>
    %cst_28 = arith.constant dense<0.000000e+00> : vector<8x144xf32>
    %80 = tpu.matmul %79, %78, %cst_28 {dimension_numbers = #tpu.dot_dimension_numbers<[1], [0], [0], [1], [0, 0, 1, 1], [], []>} : vector<8x32xbf16>, vector<32x144xbf16>, vector<8x144xf32> -> vector<8x144xf32>
    %c6 = arith.constant 6 : index
    %c0_29 = arith.constant 0 : index
    %81 = vector.load %arg2[%c6, %c0_29] : memref<16x256xf32, #tpu.memory_space<vmem>>, vector<1x144xf32>
    %82 = vector.broadcast %81 : vector<1x144xf32> to vector<8x144xf32>
    %83 = arith.addf %80, %82 : vector<8x144xf32>
    %84 = vector.extract_strided_slice %83 {offsets = [0, 0], sizes = [8, 16], strides = [1, 1]} : vector<8x144xf32> to vector<8x16xf32>
    %85 = vector.extract_strided_slice %83 {offsets = [0, 128], sizes = [8, 16], strides = [1, 1]} : vector<8x144xf32> to vector<8x16xf32>
    %cst_30 = arith.constant 5.000000e-01 : f32
    %86 = vector.broadcast %cst_30 : f32 to vector<8x16xf32>
    %87 = arith.mulf %86, %85 : vector<8x16xf32>
    %88 = math.exp %87 : vector<8x16xf32>
    %89 = arith.mulf %1, %88 : vector<8x16xf32>
    %90 = arith.addf %84, %89 : vector<8x16xf32>
    %c0_31 = arith.constant 0 : index
    %c768 = arith.constant 768 : index
    %91 = vector.load %arg1[%c0_31, %c768] : memref<128x1024xbf16, #tpu.memory_space<vmem>>, vector<16x16xbf16>
    %92 = arith.truncf %90 : vector<8x16xf32> to vector<8x16xbf16>
    %cst_32 = arith.constant dense<0.000000e+00> : vector<8x16xf32>
    %93 = tpu.matmul %92, %91, %cst_32 {dimension_numbers = #tpu.dot_dimension_numbers<[1], [0], [0], [1], [0, 0, 1, 1], [], []>} : vector<8x16xbf16>, vector<16x16xbf16>, vector<8x16xf32> -> vector<8x16xf32>
    %c7 = arith.constant 7 : index
    %c0_33 = arith.constant 0 : index
    %94 = vector.load %arg2[%c7, %c0_33] : memref<16x256xf32, #tpu.memory_space<vmem>>, vector<1x16xf32>
    %95 = vector.broadcast %94 : vector<1x16xf32> to vector<8x16xf32>
    %96 = arith.addf %93, %95 : vector<8x16xf32>
    %c8 = arith.constant 8 : index
    %c0_34 = arith.constant 0 : index
    %97 = vector.load %arg2[%c8, %c0_34] : memref<16x256xf32, #tpu.memory_space<vmem>>, vector<1x16xf32>
    %c9 = arith.constant 9 : index
    %c0_35 = arith.constant 0 : index
    %98 = vector.load %arg2[%c9, %c0_35] : memref<16x256xf32, #tpu.memory_space<vmem>>, vector<1x16xf32>
    %cst_36 = arith.constant dense<0.000000e+00> : vector<16xf32>
    %99 = vector.multi_reduction <add>, %96, %cst_36 [0] : vector<8x16xf32> to vector<16xf32>
    %100 = vector.shape_cast %99 : vector<16xf32> to vector<1x16xf32>
    %cst_37 = arith.constant 8.000000e+00 : f32
    %101 = vector.broadcast %cst_37 : f32 to vector<1x16xf32>
    %102 = arith.divf %100, %101 : vector<1x16xf32>
    %103 = arith.mulf %96, %96 : vector<8x16xf32>
    %cst_38 = arith.constant dense<0.000000e+00> : vector<16xf32>
    %104 = vector.multi_reduction <add>, %103, %cst_38 [0] : vector<8x16xf32> to vector<16xf32>
    %105 = vector.shape_cast %104 : vector<16xf32> to vector<1x16xf32>
    %cst_39 = arith.constant 8.000000e+00 : f32
    %106 = vector.broadcast %cst_39 : f32 to vector<1x16xf32>
    %107 = arith.divf %105, %106 : vector<1x16xf32>
    %108 = arith.mulf %102, %102 : vector<1x16xf32>
    %109 = arith.subf %107, %108 : vector<1x16xf32>
    %110 = vector.broadcast %102 : vector<1x16xf32> to vector<8x16xf32>
    %111 = arith.subf %96, %110 : vector<8x16xf32>
    %cst_40 = arith.constant 9.99999974E-6 : f32
    %112 = vector.broadcast %cst_40 : f32 to vector<1x16xf32>
    %113 = arith.addf %109, %112 : vector<1x16xf32>
    %114 = math.rsqrt %113 : vector<1x16xf32>
    %115 = vector.broadcast %114 : vector<1x16xf32> to vector<8x16xf32>
    %116 = arith.mulf %111, %115 : vector<8x16xf32>
    %117 = vector.broadcast %97 : vector<1x16xf32> to vector<8x16xf32>
    %118 = arith.mulf %116, %117 : vector<8x16xf32>
    %119 = vector.broadcast %98 : vector<1x16xf32> to vector<8x16xf32>
    %120 = arith.addf %118, %119 : vector<8x16xf32>
    %c10 = arith.constant 10 : index
    %c0_41 = arith.constant 0 : index
    %121 = vector.load %arg2[%c10, %c0_41] : memref<16x256xf32, #tpu.memory_space<vmem>>, vector<1x16xf32>
    %122 = vector.broadcast %121 : vector<1x16xf32> to vector<8x16xf32>
    %123 = arith.mulf %122, %120 : vector<8x16xf32>
    %124 = arith.negf %123 : vector<8x16xf32>
    %125 = math.exp %124 : vector<8x16xf32>
    %cst_42 = arith.constant 1.000000e+00 : f32
    %126 = vector.broadcast %cst_42 : f32 to vector<8x16xf32>
    %127 = arith.addf %126, %125 : vector<8x16xf32>
    %128 = arith.divf %126, %127 : vector<8x16xf32>
    %129 = arith.mulf %120, %128 : vector<8x16xf32>
    %c0_43 = arith.constant 0 : index
    %c896 = arith.constant 896 : index
    %130 = vector.load %arg1[%c0_43, %c896] : memref<128x1024xbf16, #tpu.memory_space<vmem>>, vector<16x128xbf16>
    %131 = arith.truncf %129 : vector<8x16xf32> to vector<8x16xbf16>
    %cst_44 = arith.constant dense<0.000000e+00> : vector<8x128xf32>
    %132 = tpu.matmul %131, %130, %cst_44 {dimension_numbers = #tpu.dot_dimension_numbers<[1], [0], [0], [1], [0, 0, 1, 1], [], []>} : vector<8x16xbf16>, vector<16x128xbf16>, vector<8x128xf32> -> vector<8x128xf32>
    %c11 = arith.constant 11 : index
    %c0_45 = arith.constant 0 : index
    %133 = vector.load %arg2[%c11, %c0_45] : memref<16x256xf32, #tpu.memory_space<vmem>>, vector<1x128xf32>
    %134 = vector.broadcast %133 : vector<1x128xf32> to vector<8x128xf32>
    %135 = arith.addf %132, %134 : vector<8x128xf32>
    %c0_46 = arith.constant 0 : index
    %c0_47 = arith.constant 0 : index
    %136 = vector.load %arg3[%c0_46, %c0_47] : memref<8x128xf32, #tpu.memory_space<vmem>>, vector<8x128xf32>
    tpu.vector_store %arg3[%c0_46, %c0_47], %135 {strides = array<i32>} : memref<8x128xf32, #tpu.memory_space<vmem>>, vector<8x128xf32>,
    return
  }
}

</mosaic_0001>

<bundles_post_ra>
// kernel: vae_classification_forward.1
= control target key start
LH: loop header
LB: loop body
LE: loop exit
PB: predicated region body
PF: predicated region fallthrough
CT: control target
= control target key end

     0   :  { %8 = vsyncpa [#allocation3], 0  ;;  %s681_s12 = smov [#allocation2]   ;;  %s783_s0 = inlined_call_operand.vmem [shape: f32[8,256], index: 0, kind: input, shape index: {}]   ;;  %s784_s1 = inlined_call_operand.hbm [shape: bf16[128,1024], index: 1, kind: input, shape index: {}]   ;;  %s785_s2 = inlined_call_operand.vmem [shape: f32[16,256], index: 2, kind: input, shape index: {}]   ;;  %s786_s3 = inlined_call_operand.vmem [shape: f32[8,128], index: 3, kind: output, shape index: {}]  }
   0x1   :  { %s16_s13 = sshll.u32 %s681_s12, 4  ;;  %s657_s16 = scalar_lea.hbm %s784_s1, 8192  ;;  %s17_s13 = int_to_ptr.vmem [resolvable:$true] %s16_s13 }
   0x2   :  { %p658_p0 = scmp.ne.s32.totalorder %s784_s1, %s657_s16  ;;  %p661_p1 = scmp.lt.u32.totalorder %s657_s16, %s784_s1 }
   0x4   :  { %p663_p2 = pnand %p661_p1, %p658_p0 }
   0x6   :  { %666 = shalt.err (!%p663_p2)
}
   0x7   :  { %s667_s21 = scalar_lea.vmem %s17_s13, 8192  ;;  %p672_p4 = scmp.lt.s32.totalorder %s17_s13, %s17_s13 }
   0x8   :  { %p668_p3 = scmp.ne.s32.totalorder %s17_s13, %s667_s21  ;;  %p673_p5 = scmp.lt.s32.totalorder %s667_s21, %s667_s21 }
   0xa   :  { %p674_p6 = por %p673_p5, %p672_p4 }
   0xc   :  { %p675_p7 = pnand %p674_p6, %p668_p3 }
   0xe   :  { %678 = shalt.err (!%p675_p7)
}
   0xf   :  { %s682_s22 = smov 512   ;;  %s683_s23 = smov 32  }
  0x10   :  { %22 = dma.hbm_to_vmem [thread:$0]  %s784_s1, 8192, %s17_s13, [#allocation3], %s682_s22, %s682_s22, %s683_s23  }
  0x11   :  { %679 = dma.done.wait [#allocation3], 8192  }
  0x12   :  { %680 = vsyncadd [#allocation3], 4294959104  ;;  %v684_v0 = vmov 0   ;;  %v31_v1 = vld [vmem:[#allocation2] sm:$0xff]  ;;  %vm92_vm0 = vcmask 523264   ;;  %v167_v19 = vld [vmem:[#allocation2 + $0x8] sm:$0xff]  ;;  %v42_v51 = vlaneseq }
  0x13   :  { %128 = vmatprep.mubr.bf16.mxu0 %v684_v0  ;;  %309 = vmatprep.mubr.bf16.mxu1 %v684_v0  ;;  %v32_v2 = vld [vmem:[#allocation2 + $0x20] sm:$0xff]  ;;  %v168_v20 = vld [vmem:[#allocation2 + $0x28] sm:$0xff]  ;;  %vm320_vm2 = vcmask 261120   ;;  %vm686_vm4 = vmmov 0   ;;  %vm447_vm5 = vcmask 130048  }
  0x14   :  { %v33_v3 = vld [vmem:[#allocation2 + $0x40] sm:$0xff]  ;;  %v587_v4 = vcombine.high %v31_v1, %v32_v2  ;;  %v586_v5 = vcombine.low %v31_v1, %v32_v2  ;;  %v597_v21 = vcombine.high %v167_v19, %v168_v20  ;;  %v596_v22 = vcombine.low %v167_v19, %v168_v20  ;;  %v169_v23 = vld [vmem:[#allocation2 + $0x48] sm:$0xff] }
  0x15   :  { %v34_v6 = vld [vmem:[#allocation2 + $0x60] sm:$0xff]  ;;  %v170_v24 = vld [vmem:[#allocation2 + $0x68] sm:$0xff]  ;;  %v43_v52 = vshrl.u32 %v42_v51, 7 }
  0x16   :  { %v589_v7 = vcombine.high %v33_v3, %v34_v6  ;;  %v35_v8 = vld [vmem:[#allocation2 + $0x80] sm:$0xff]  ;;  %96 = vmatprep.subr.bf16.mxu0 %v587_v4  ;;  %v588_v10 = vcombine.low %v33_v3, %v34_v6  ;;  %277 = vmatprep.subr.bf16.mxu1 %v597_v21  ;;  %v599_v25 = vcombine.high %v169_v23, %v170_v24  ;;  %v171_v27 = vld [vmem:[#allocation2 + $0x88] sm:$0xff] }
  0x17   :  { %v36_v9 = vld [vmem:[#allocation2 + $0xa0] sm:$0xff]  ;;  %97 = vmatpush1.bf16.msra.mxu0 %v586_v5  ;;  %278 = vmatpush1.bf16.msra.mxu1 %v596_v22  ;;  %v598_v26 = vcombine.low %v169_v23, %v170_v24  ;;  %v172_v28 = vld [vmem:[#allocation2 + $0xa8] sm:$0xff]  ;;  %v722_v53 = vsub.s32 0, %v43_v52 }
  0x18   :  { %98 = vmatprep.subr.bf16.mxu0 %v589_v7  ;;  %v591_v11 = vcombine.high %v35_v8, %v36_v9  ;;  %v37_v12 = vld [vmem:[#allocation2 + $0xc0] sm:$0xff]  ;;  %v590_v14 = vcombine.low %v35_v8, %v36_v9  ;;  %279 = vmatprep.subr.bf16.mxu1 %v599_v25  ;;  %v601_v29 = vcombine.high %v171_v27, %v172_v28  ;;  %v173_v31 = vld [vmem:[#allocation2 + $0xc8] sm:$0xff] }
  0x19   :  { %v38_v13 = vld [vmem:[#allocation2 + $0xe0] sm:$0xff]  ;;  %v600_v30 = vcombine.low %v171_v27, %v172_v28  ;;  %v174_v32 = vld [vmem:[#allocation2 + $0xe8] sm:$0xff] }
  0x1a   :  { %v593_v15 = vcombine.high %v37_v12, %v38_v13  ;;  %v592_v16 = vcombine.low %v37_v12, %v38_v13  ;;  %v29_v17 = vld [vmem:[%s783_s0] sm:$0xff]  ;;  %v603_v33 = vcombine.high %v173_v31, %v174_v32  ;;  %v602_v34 = vcombine.low %v173_v31, %v174_v32  ;;  %v175_v35 = vld [vmem:[#allocation2 + $0x108] sm:$0xff] }
  0x1b   :  { %99 = vmatpush1.bf16.msra.mxu0 %v588_v10  ;;  %v39_v18 = vpack.c.bf16 %v29_v17, %v29_v17  ;;  %280 = vmatpush1.bf16.msra.mxu1 %v598_v26  ;;  %v176_v36 = vld [vmem:[#allocation2 + $0x128] sm:$0xff]  ;;  %v728_v17 = vsub.s32 1, %v43_v52  ;;  %v138_v20 = vld [vmem:[%s785_s2 + $0x2] ss:$0 sm:$0xff] }
  0x1c   :  { %100 = vmatprep.subr.bf16.mxu0 %v591_v11  ;;  %281 = vmatprep.subr.bf16.mxu1 %v601_v29  ;;  %v605_v37 = vcombine.high %v175_v35, %v176_v36  ;;  %v604_v38 = vcombine.low %v175_v35, %v176_v36  ;;  %v177_v39 = vld [vmem:[#allocation2 + $0x148] sm:$0xff]  ;;  %v350_v29 = vld [vmem:[#allocation2 + $0x10] sm:$0xff] }
  0x1d   :  { %v178_v40 = vld [vmem:[#allocation2 + $0x168] sm:$0xff] }
  0x1e   :  { %v607_v41 = vcombine.high %v177_v39, %v178_v40  ;;  %v606_v42 = vcombine.low %v177_v39, %v178_v40  ;;  %v179_v43 = vld [vmem:[#allocation2 + $0x188] sm:$0xff] }
  0x1f   :  { %101 = vmatpush1.bf16.msra.mxu0 %v590_v14  ;;  %282 = vmatpush1.bf16.msra.mxu1 %v600_v30  ;;  %v180_v44 = vld [vmem:[#allocation2 + $0x1a8] sm:$0xff]  ;;  %v351_v30 = vld [vmem:[#allocation2 + $0x30] sm:$0xff] }
  0x20   :  { %102 = vmatprep.subr.bf16.mxu0 %v593_v15  ;;  %283 = vmatprep.subr.bf16.mxu1 %v603_v33  ;;  %v609_v45 = vcombine.high %v179_v43, %v180_v44  ;;  %v608_v46 = vcombine.low %v179_v43, %v180_v44  ;;  %v181_v47 = vld [vmem:[#allocation2 + $0x1c8] sm:$0xff]  ;;  %v614_v31 = vcombine.high %v350_v29, %v351_v30  ;;  %v352_v33 = vld [vmem:[#allocation2 + $0x50] sm:$0xff] }
  0x21   :  { %v182_v48 = vld [vmem:[#allocation2 + $0x1e8] sm:$0xff]  ;;  %v613_v32 = vcombine.low %v350_v29, %v351_v30 }
  0x22   :  { %v611_v49 = vcombine.high %v181_v47, %v182_v48  ;;  %v610_v50 = vcombine.low %v181_v47, %v182_v48  ;;  %v40_v54 = vld [vmem:[%s785_s2] ss:$8 sm:$0x3] }
  0x23   :  { %103 = vmatpush1.bf16.msra.mxu0 %v592_v16  ;;  %284 = vmatpush1.bf16.msra.mxu1 %v602_v34  ;;  %v45_v55 = vrot.slane %v40_v54, %v722_v53  ;;  %v49_v22 = vrot.slane %v40_v54, %v728_v17  ;;  %v353_v34 = vld [vmem:[#allocation2 + $0x70] sm:$0xff]  ;;  %v30_v29 = vld [vmem:[%s783_s0 + $0x8] sm:$0xff] }
  0x24   :  { %285 = vmatprep.subr.bf16.mxu1 %v605_v37  ;;  %391 = vmatprep.subr.bf16.mxu0 %v614_v31  ;;  %v616_v35 = vcombine.high %v352_v33, %v353_v34  ;;  %v615_v36 = vcombine.low %v352_v33, %v353_v34  ;;  %v595_v37 = vld [vmem:[%s785_s2 + $0x3] ss:$8 sm:$0x3]  ;;  %v527_v34 = vld [vmem:[#allocation2 + $0x1c] sm:$0xf] }
  0x26   :  { %594 = vmatmul.mubr.msk.bf16.vlgmr.msra.gmra.mrb[0].mxu0 %vm92_vm0, %v39_v18  ;;  %v137_v18 = vld [vmem:[%s785_s2 + $0x1] ss:$0 sm:$0xff] }
  0x27   :  { %423 = vmatprep.mubr.bf16.mxu0 %v684_v0  ;;  %286 = vmatpush1.bf16.msra.mxu1 %v604_v38  ;;  %v190_v38 = vrot.slane %v595_v37, %v722_v53 }
  0x28   :  { %287 = vmatprep.subr.bf16.mxu1 %v607_v41  ;;  %392 = vmatpush1.bf16.msra.mxu0 %v613_v32 }
  0x29   :  { %393 = vmatprep.subr.bf16.mxu0 %v616_v35  ;;  %v528_v35 = vld [vmem:[#allocation2 + $0x3c] sm:$0xf] }
  0x2b   :  { %288 = vmatpush1.bf16.msra.mxu1 %v606_v42 }
  0x2c   :  { %289 = vmatprep.subr.bf16.mxu1 %v609_v45  ;;  %394 = vmatpush1.bf16.msra.mxu0 %v615_v36  ;;  %v621_v36 = vcombine.low %v527_v34, %v528_v35 }
  0x2f   :  { %290 = vmatpush1.bf16.msra.mxu1 %v608_v46 }
  0x30   :  { %291 = vmatprep.subr.bf16.mxu1 %v611_v49 }
  0x33   :  { %292 = vmatpush1.bf16.msra.mxu1 %v610_v50 }
  0xf9   :  { %v130_v56 = vpop.f32.mrb[0].mxu0 }
  0xfa   :  { %v131_v57 = vadd.f32 %v130_v56, %v45_v55  ;;  %v132_v58 = vpop.f32.mrb[1].mxu0 }
  0xfb   :  { %v134_v59 = vpop.f32.mrb[2].mxu0  ;;  %v133_v25 = vadd.f32 %v132_v58, %v49_v22 }
  0xfc   :  { %v139_v60 = vrot.slane %v131_v57, 4  ;;  %v147_v61 = vmul.f32 %v131_v57, %v131_v57  ;;  %v135_v62 = vpop.f32.mrb[3].mxu0 }
  0xfe   :  { %v140_v63 = vadd.f32 %v139_v60, %v131_v57  ;;  %v148_v0 = vrot.slane %v147_v61, 4 }
 0x100   :  { %v141_v1 = vrot.slane %v140_v63, 2  ;;  %v149_v2 = vadd.f32 %v148_v0, %v147_v61 }
 0x102   :  { %v142_v3 = vadd.f32 %v141_v1, %v140_v63  ;;  %v150_v4 = vrot.slane %v149_v2, 2 }
 0x104   :  { %v143_v5 = vrot.slane %v142_v3, 1  ;;  %v151_v6 = vadd.f32 %v150_v4, %v149_v2 }
 0x106   :  { %v144_v7 = vadd.f32 %v143_v5, %v142_v3  ;;  %v152_v8 = vrot.slane %v151_v6, 1  ;;  %v318_v3 = vld [vmem:[%s785_s2 + $0x4] ss:$0 sm:$0xff]  ;;  %v319_v5 = vld [vmem:[%s785_s2 + $0x5] ss:$0 sm:$0xff] }
 0x108   :  { %v146_v9 = vmul.f32 0.125, %v144_v7  ;;  %v153_v10 = vadd.f32 %v152_v8, %v151_v6  ;;  %v194_v7 = vrot.slane %v595_v37, %v728_v17 }
 0x10a   :  { %v154_v11 = vmul.f32 0.125, %v153_v10  ;;  %v155_v12 = vmul.f32 %v146_v9, %v146_v9  ;;  %v157_v15 = vsub.f32 %v131_v57, %v146_v9 }
 0x10c   :  { %v156_v13 = vsub.f32 %v154_v11, %v155_v12 }
 0x10e   :  { %v158_v14 = vadd.f32 1e-05, %v156_v13 }
 0x110   :  { %645 = vrsqrt.f32 %v158_v14  ;;  %v437_v14 = vld [vmem:[#allocation2 + $0x18] sm:$0xf] }
 0x11a   :  { %v646_v16 = vpop.eup %645 }
 0x11b   :  { %v160_v19 = vmul.f32 %v646_v16, %v157_v15  ;;  %v438_v15 = vld [vmem:[#allocation2 + $0x38] sm:$0xf]  ;;  %v685_v16 = vmov 0.0  }
 0x11c   :  { %627 = vmatprep.subr.bf16.mxu0 %v685_v16 }
 0x11d   :  { %v161_v21 = vmul.f32 %v160_v19, %v137_v18  ;;  %v618_v18 = vcombine.low %v437_v14, %v438_v15  ;;  %v612_v19 = vld [vmem:[%s785_s2 + $0x6] ss:$8 sm:$0x3]  ;;  %v530_v14 = vld [vmem:[%s785_s2 + $0x13] ss:$0 sm:$0xff] }
 0x11f   :  { %v162_v23 = vadd.f32 %v161_v21, %v138_v20  ;;  %v365_v20 = vrot.slane %v612_v19, %v728_v17 }
 0x121   :  { %vm163_vm1 = vcmp.ge.f32.partialorder %v162_v23, 0.0  ;;  %v164_v24 = vmul.f32 0.01, %v162_v23 }
 0x123   :  { %v165_v26 = vsel %vm163_vm1, %v162_v23, %v164_v24 }
 0x124   :  { %v166_v27 = vadd.f32 %v165_v26, %v133_v25 }
 0x126   :  { %v183_v28 = vpack.c.bf16 %v166_v27, %v166_v27 }
 0x128   :  { %310 = vmatmul.mubr.bf16.vlgmr.msra.gmra.mrb[0].mxu1 %v183_v28  ;;  %v361_v28 = vrot.slane %v612_v19, %v722_v53  ;;  %v440_v53 = vld [vmem:[%s785_s2 + $0x7] ss:$0 sm:$0xff] }
 0x1fb   :  { %v311_v39 = vpop.f32.mrb[0].mxu1 }
 0x1fc   :  { %v312_v40 = vadd.f32 %v311_v39, %v190_v38  ;;  %v313_v41 = vpop.f32.mrb[1].mxu1 }
 0x1fd   :  { %v315_v42 = vpop.f32.mrb[2].mxu1  ;;  %v314_v10 = vadd.f32 %v313_v41, %v194_v7 }
 0x1fe   :  { %v321_v43 = vsel %vm320_vm2, %v312_v40, 0.0  ;;  %v329_v44 = vmul.f32 %v312_v40, %v312_v40  ;;  %v316_v45 = vpop.f32.mrb[3].mxu1 }
 0x1ff   :  { %v322_v46 = vrot.slane %v321_v43, 4 }
 0x200   :  { %v330_v47 = vsel %vm320_vm2, %v329_v44, 0.0 }
 0x201   :  { %v323_v48 = vadd.f32 %v322_v46, %v321_v43  ;;  %v331_v49 = vrot.slane %v330_v47, 4 }
 0x203   :  { %v324_v50 = vrot.slane %v323_v48, 2  ;;  %v332_v51 = vadd.f32 %v331_v49, %v330_v47 }
 0x205   :  { %v325_v52 = vadd.f32 %v324_v50, %v323_v48  ;;  %v333_v54 = vrot.slane %v332_v51, 2 }
 0x207   :  { %v326_v55 = vrot.slane %v325_v52, 1  ;;  %v334_v56 = vadd.f32 %v333_v54, %v332_v51 }
 0x209   :  { %v327_v57 = vadd.f32 %v326_v55, %v325_v52  ;;  %v335_v58 = vrot.slane %v334_v56, 1 }
 0x20b   :  { %v328_v59 = vmul.f32 0.125, %v327_v57  ;;  %v336_v60 = vadd.f32 %v335_v58, %v334_v56 }
 0x20d   :  { %v337_v61 = vmul.f32 0.125, %v336_v60  ;;  %v338_v62 = vmul.f32 %v328_v59, %v328_v59  ;;  %v340_v1 = vsub.f32 %v312_v40, %v328_v59 }
 0x20f   :  { %v339_v63 = vsub.f32 %v337_v61, %v338_v62 }
 0x211   :  { %v341_v0 = vadd.f32 1e-05, %v339_v63 }
 0x213   :  { %647 = vrsqrt.f32 %v341_v0 }
 0x21d   :  { %v648_v2 = vpop.eup %647 }
 0x21e   :  { %v343_v4 = vmul.f32 %v648_v2, %v340_v1  ;;  %v491_v1 = vld [vmem:[%s785_s2 + $0x10] ss:$0 sm:$0xff] }
 0x220   :  { %v344_v6 = vmul.f32 %v343_v4, %v318_v3  ;;  %v492_v3 = vld [vmem:[%s785_s2 + $0x11] ss:$0 sm:$0xff] }
 0x222   :  { %v345_v8 = vadd.f32 %v344_v6, %v319_v5  ;;  %v518_v5 = vld [vmem:[%s785_s2 + $0x12] ss:$0 sm:$0xff] }
 0x224   :  { %vm346_vm3 = vcmp.ge.f32.partialorder %v345_v8, 0.0  ;;  %v347_v9 = vmul.f32 0.01, %v345_v8 }
 0x226   :  { %v348_v11 = vsel %vm346_vm3, %v345_v8, %v347_v9 }
 0x227   :  { %v349_v12 = vadd.f32 %v348_v11, %v314_v10 }
 0x229   :  { %v354_v13 = vpack.c.bf16 %v349_v12, %v349_v12 }
 0x22b   :  { %617 = vmatmul.mubr.msk.bf16.vlgmr.msra.gmra.mrb[4].mxu0 %vm320_vm2, %v354_v13 }
 0x22c   :  { %629 = vmatprep.mubr.msk.bf16.mxu0 %vm686_vm4, %v685_v16  ;;  %628 = vmatpush3.bf16.msra.mxu0 %v618_v18 }
 0x22d   :  { %633 = vmatprep.subr.bf16.mxu0 %v685_v16 }
 0x2fe   :  { %v425_v21 = vpop.f32.mrb[4].mxu0 }
 0x2ff   :  { %v427_v22 = vpop.f32.mrb[5].mxu0  ;;  %v426_v31 = vadd.f32 %v425_v21, %v361_v28 }
 0x300   :  { %v428_v23 = vadd.f32 %v427_v22, %v365_v20  ;;  %v429_v24 = vpop.f32.mrb[6].mxu0 }
 0x301   :  { %v430_v25 = vpop.f32.mrb[7].mxu0 }
 0x302   :  { %v432_v26 = vmul.f32 0.5, %v428_v23 }
 0x304   :  { %v433_v27 = vmul.f32 1.442695, %v432_v26 }
 0x306   :  { %649 = vpow2.f32 %v433_v27 }
 0x310   :  { %v650_v30 = vpop.eup %649 }
 0x311   :  { %v435_v32 = vmul.f32 %v650_v30, %v30_v29 }
 0x313   :  { %v436_v33 = vadd.f32 %v435_v32, %v426_v31 }
 0x315   :  { %v439_v17 = vpack.c.bf16 %v436_v33, %v436_v33 }
 0x317   :  { %630 = vmatmul.mubr.msk.bf16.vlgmr.msra.gmra.mrb[8].mxu0 %vm447_vm5, %v439_v17 }
 0x318   :  { %635 = vmatprep.mubr.msk.bf16.mxu0 %vm686_vm4, %v685_v16  ;;  %634 = vmatpush3.bf16.msra.mxu0 %v621_v36 }
 0x3ea   :  { %v485_v37 = vpop.f32.mrb[8].mxu0 }
 0x3eb   :  { %v486_v38 = vadd.f32 %v485_v37, %v440_v53  ;;  %v631_v39 = vpop.f32.mrb[9].mxu0 }
 0x3ec   :  { %v488_v40 = vpop.f32.mrb[10].mxu0 }
 0x3ed   :  { %v493_v41 = vsel %vm447_vm5, %v486_v38, 0.0  ;;  %v501_v42 = vmul.f32 %v486_v38, %v486_v38  ;;  %v632_v43 = vpop.f32.mrb[11].mxu0 }
 0x3ee   :  { %v494_v44 = vrot.slane %v493_v41, 4 }
 0x3ef   :  { %v502_v45 = vsel %vm447_vm5, %v501_v42, 0.0 }
 0x3f0   :  { %v495_v46 = vadd.f32 %v494_v44, %v493_v41  ;;  %v503_v47 = vrot.slane %v502_v45, 4 }
 0x3f2   :  { %v496_v48 = vrot.slane %v495_v46, 2  ;;  %v504_v49 = vadd.f32 %v503_v47, %v502_v45 }
 0x3f4   :  { %v497_v50 = vadd.f32 %v496_v48, %v495_v46  ;;  %v505_v51 = vrot.slane %v504_v49, 2 }
 0x3f6   :  { %v498_v52 = vrot.slane %v497_v50, 1  ;;  %v506_v54 = vadd.f32 %v505_v51, %v504_v49 }
 0x3f8   :  { %v499_v55 = vadd.f32 %v498_v52, %v497_v50  ;;  %v507_v56 = vrot.slane %v506_v54, 1 }
 0x3fa   :  { %v500_v57 = vmul.f32 0.125, %v499_v55  ;;  %v508_v58 = vadd.f32 %v507_v56, %v506_v54 }
 0x3fc   :  { %v509_v59 = vmul.f32 0.125, %v508_v58  ;;  %v510_v60 = vmul.f32 %v500_v57, %v500_v57  ;;  %v512_v63 = vsub.f32 %v486_v38, %v500_v57 }
 0x3fe   :  { %v511_v61 = vsub.f32 %v509_v59, %v510_v60 }
 0x400   :  { %v513_v62 = vadd.f32 1e-05, %v511_v61 }
 0x402   :  { %651 = vrsqrt.f32 %v513_v62 }
 0x40c   :  { %v652_v0 = vpop.eup %651 }
 0x40d   :  { %v515_v2 = vmul.f32 %v652_v0, %v512_v63 }
 0x40f   :  { %v516_v4 = vmul.f32 %v515_v2, %v491_v1 }
 0x411   :  { %v517_v6 = vadd.f32 %v516_v4, %v492_v3 }
 0x413   :  { %v519_v7 = vmul.f32 %v518_v5, %v517_v6 }
 0x415   :  { %v620_v8 = vmul.f32 -1.442695, %v519_v7 }
 0x417   :  { %653 = vpow2.f32 %v620_v8 }
 0x421   :  { %v654_v9 = vpop.eup %653 }
 0x422   :  { %v523_v10 = vadd.f32 1.0, %v654_v9 }
 0x424   :  { %655 = vrcp.f32 %v523_v10 }
 0x42e   :  { %v656_v11 = vpop.eup %655 }
 0x42f   :  { %v526_v12 = vmul.f32 %v656_v11, %v517_v6 }
 0x431   :  { %v529_v13 = vpack.c.bf16 %v526_v12, %v526_v12 }
 0x433   :  { %636 = vmatmul.mubr.msk.bf16.vlgmr.msra.gmra.mrb[12].mxu0 %vm447_vm5, %v529_v13 }
 0x506   :  { %v574_v15 = vpop.f32.mrb[12].mxu0 }
 0x507   :  { %v575_v16 = vadd.f32 %v574_v15, %v530_v14  ;;  %v637_v18 = vpop.f32.mrb[13].mxu0 }
 0x508   :  { %v577_v19 = vpop.f32.mrb[14].mxu0 }
 0x509   :  { %580 = vst [vmem:[%s786_s3] sm:$0xff] %v575_v16  ;;  %v638_v20 = vpop.f32.mrb[15].mxu0 }
 0x50a   :  { %585 = vsyncpa [#allocation3], 1 }

</bundles_post_ra>
